<compile_context>
chip_gen: v5e
topology: v5e:2x2
jax: 0.10.0
libtpu: 0.0.40
codegen_flags: <defaults>
</compile_context>

<pallas_src>
import functools

import jax
import jax.numpy as jnp
import numpy as np
from jax.experimental import pallas as pl
from jax.experimental.pallas import tpu as pltpu

_LANE = 128


def _round_up(x, m):
    return ((x + m - 1) // m) * m


def _leaky_relu(x, slope=0.2):
    return jnp.where(x > 0, x, slope * x)


# ---------------------------------------------------------------------------
# Kernel: whole MLP fused; layer 1 optionally K-split over grid axis 1.
# ---------------------------------------------------------------------------
def _disc_kernel(x_ref, w1_ref, b1_ref, w2_ref, b2_ref, w3_ref, b3_ref,
                 out_ref, h1_acc):
    k = pl.program_id(1)
    nk = pl.num_programs(1)
    cdt = w1_ref.dtype                     # matmul operand dtype (bf16 default)

    @pl.when(k == 0)
    def _():
        h1_acc[...] = jnp.zeros_like(h1_acc)

    # Layer-1 partial product: x stays f32 in HBM/VMEM, cast right before the
    # MXU (hidden under the matmul); f32 accumulation in VMEM scratch.
    h1_acc[...] += jnp.dot(x_ref[...].astype(cdt), w1_ref[...],
                           preferred_element_type=jnp.float32)

    @pl.when(k == nk - 1)
    def _():
        h1 = _leaky_relu(h1_acc[...] + b1_ref[...])
        h2 = jnp.dot(h1.astype(cdt), w2_ref[...],
                     preferred_element_type=jnp.float32)
        h2 = _leaky_relu(h2 + b2_ref[...])
        out = jnp.dot(h2.astype(cdt), w3_ref[...],
                      preferred_element_type=jnp.float32)
        out_ref[...] = (out + b3_ref[...]).astype(out_ref.dtype)


# ---------------------------------------------------------------------------
# Tiling policy (generation-aware)
# ---------------------------------------------------------------------------
def _device_profile():
    """(VMEM budget bytes, TensorCores per chip) for the current TPU."""
    try:
        kind = jax.devices()[0].device_kind.lower()
    except Exception:
        kind = ""
    if "7" in kind:                 # v7x: 64 MiB VMEM per TC, 2 TensorCores
        return 44 << 20, 2
    return 96 << 20, 1              # v5e / v6e: 128 MiB VMEM, 1 TensorCore


def _vmem_footprint(block_b, k_tile, nk, h1, h2, d_out_p, cbytes, obytes):
    x_b = 2 * block_b * k_tile * 4                        # f32 x tile, 2 buffers
    w1_b = (1 if nk == 1 else 2) * k_tile * h1 * cbytes   # W1 tile(s)
    w_rest = (h1 * h2 + h2 * d_out_p) * cbytes + (h1 + h2 + d_out_p) * 4
    acc_b = block_b * h1 * 4                              # f32 h1 accumulator
    out_b = 2 * block_b * d_out_p * obytes                # output slab
    tmp_b = block_b * (h1 + h2 + d_out_p) * 4             # live f32 temporaries
    return x_b + w1_b + w_rest + acc_b + out_b + tmp_b + (2 << 20)


def _choose_k_tile(d_in, h1, h2, d_out_p, cbytes, obytes, budget):
    """Layer-1 K tile.  k_tile == d_in means layer 1 is fully fused."""
    if _vmem_footprint(256, d_in, 1, h1, h2, d_out_p, cbytes, obytes) <= budget:
        return d_in
    tk = 2048
    while tk > 512 and _vmem_footprint(256, tk, 2, h1, h2, d_out_p,
                                       cbytes, obytes) > budget:
        tk //= 2
    return tk


def _choose_block_b(B, k_tile, nk, h1, h2, d_out_p, n_cores, cbytes, obytes,
                    budget):
    if n_cores >= 2:                          # v7x megacore
        if B <= 32:
            bb = B
        elif B <= 512:
            bb = _round_up(-(-B // 2), 16)    # 2 steps -> both TensorCores busy
        else:
            bb = 256
    else:                                     # v5e / v6e: big tiles amortize
        bb = B if B <= 1024 else 1024         # the ~0.35us per-step overhead
    floor = min(bb, 256)                      # never shrink M below 256
    while bb > floor and _vmem_footprint(bb, k_tile, nk, h1, h2, d_out_p,
                                         cbytes, obytes) > budget:
        bb = max(floor, _round_up(bb // 2, 16))
    return bb


# ---------------------------------------------------------------------------
# One-time parameter preparation (hoisted out of the per-call path)
# ---------------------------------------------------------------------------
def prepare_params(params, compute_dtype=jnp.bfloat16):
    """Cast weights to the matmul dtype and pad for lane-dense layout.

    Call once; reuse the result for every discriminator_forward call so the
    cast/pad HBM passes are not paid per forward.
    """
    w1, b1, w2, b2, w3, b3 = params
    d_in, h1 = w1.shape
    h2 = w2.shape[1]
    d_out = w3.shape[1]
    d_out_p = _round_up(d_out, _LANE)

    budget, _ = _device_profile()
    cb = jnp.dtype(compute_dtype).itemsize
    ob = cb if cb < 4 else 4
    k_tile = _choose_k_tile(d_in, h1, h2, d_out_p, cb, ob, budget)
    d_in_p = _round_up(d_in, k_tile)

    w1c = w1.astype(compute_dtype)
    if d_in_p != d_in:         # only when layer 1 is K-split (very large d_in)
        w1c = jnp.pad(w1c, ((0, d_in_p - d_in), (0, 0)))
    w2c = w2.astype(compute_dtype)
    w3c = jnp.pad(w3.astype(compute_dtype), ((0, 0), (0, d_out_p - d_out)))
    b1c = jnp.reshape(b1, (1, h1)).astype(jnp.float32)
    b2c = jnp.reshape(b2, (1, h2)).astype(jnp.float32)
    b3c = jnp.pad(jnp.reshape(b3, (1, d_out)).astype(jnp.float32),
                  ((0, 0), (0, d_out_p - d_out)))
    return (w1c, b1c, w2c, b2c, w3c, b3c)


# ---------------------------------------------------------------------------
# Forward
# ---------------------------------------------------------------------------
@functools.partial(jax.jit, static_argnames=("d_out", "block_b", "k_tile"))
def discriminator_forward(img, prepared_params, d_out=1, block_b=None,
                          k_tile=None):
    """img: (B, C, H, W) float32 -> validity logits (B, d_out) float32."""
    w1c, b1c, w2c, b2c, w3c, b3c = prepared_params
    B = img.shape[0]
    d_in = int(np.prod(img.shape[1:]))
    h1 = w1c.shape[1]
    h2 = w2c.shape[1]
    d_out_p = w3c.shape[1]

    compute_dtype = w1c.dtype
    cb = jnp.dtype(compute_dtype).itemsize
    out_dtype = compute_dtype if cb < 4 else jnp.float32   # bf16 output slab
    ob = jnp.dtype(out_dtype).itemsize

    budget, n_cores = _device_profile()
    if k_tile is None:
        k_tile = _choose_k_tile(d_in, h1, h2, d_out_p, cb, ob, budget)
    d_in_p = _round_up(d_in, k_tile)
    if w1c.shape[0] != d_in_p:
        raise ValueError(
            f"prepared W1 has {w1c.shape[0]} rows, expected {d_in_p}; "
            "re-run prepare_params or pass a matching k_tile")
    nk = d_in_p // k_tile
    if block_b is None:
        block_b = _choose_block_b(B, k_tile, nk, h1, h2, d_out_p, n_cores,
                                  cb, ob, budget)
    grid_b = pl.cdiv(B, block_b)

    # x: reshape only (free) -- no cast or pad pass over HBM in the common
    # (fused layer-1) path.  Batch is NOT padded; Pallas masks partial blocks.
    x = img.reshape(B, d_in)
    if d_in_p != d_in:
        # rare huge-d_in (K-split) path: zero-pad the reduction dim to a
        # k_tile multiple so partial K blocks never feed garbage into the sum.
        x = jnp.pad(x, ((0, 0), (0, d_in_p - d_in)))

    footprint = _vmem_footprint(block_b, k_tile, nk, h1, h2, d_out_p, cb, ob)
    vmem_limit = int(min(max(footprint * 5 // 4, 32 << 20), budget))

    flops = 2 * B * (d_in_p * h1 + h1 * h2 + h2 * d_out_p)
    bytes_accessed = int(
        B * d_in_p * 4
        + sum(int(a.size) * a.dtype.itemsize
              for a in (w1c, b1c, w2c, b2c, w3c, b3c))
        + B * d_out_p * ob)

    def _resident(shape):   # grid-invariant operand: fetched once, 1 buffer
        return pl.BlockSpec(shape, lambda i, k: (0, 0),
                            pipeline_mode=pl.Buffered(1))

    if nk == 1:
        w1_spec = _resident((k_tile, h1))
    else:
        w1_spec = pl.BlockSpec((k_tile, h1), lambda i, k: (k, 0))

    out = pl.pallas_call(
        _disc_kernel,
        out_shape=jax.ShapeDtypeStruct((B, d_out_p), out_dtype),
        grid_spec=pltpu.PrefetchScalarGridSpec(
            num_scalar_prefetch=0,
            grid=(grid_b, nk),
            in_specs=[
                pl.BlockSpec((block_b, k_tile), lambda i, k: (i, k)),  # x tile
                w1_spec,                                               # W1
                _resident((1, h1)),                                    # b1
                _resident((h1, h2)),                                   # W2
                _resident((1, h2)),                                    # b2
                _resident((h2, d_out_p)),                              # W3
                _resident((1, d_out_p)),                               # b3
            ],
            out_specs=pl.BlockSpec((block_b, d_out_p), lambda i, k: (i, 0)),
            scratch_shapes=[pltpu.VMEM((block_b, h1), jnp.float32)],
        ),
        compiler_params=pltpu.CompilerParams(
            dimension_semantics=("parallel", "arbitrary"),
            vmem_limit_bytes=vmem_limit,
        ),
        cost_estimate=pl.CostEstimate(
            flops=flops, transcendentals=0, bytes_accessed=bytes_accessed),
    )(x, w1c, b1c, w2c, b2c, w3c, b3c)

    return out[:, :d_out].astype(jnp.float32)


# ---------------------------------------------------------------------------
# Reference + test harness
# ---------------------------------------------------------------------------
def init_params(key, d_in, h1=512, h2=256, d_out=1):
    """torch.nn.Linear-style init: U[-1/sqrt(fan_in), 1/sqrt(fan_in)]."""
    ks = jax.random.split(key, 6)

    def uni(k, shape, fan_in):
        bound = 1.0 / np.sqrt(fan_in)
        return jax.random.uniform(k, shape, jnp.float32, -bound, bound)

    return (uni(ks[0], (d_in, h1), d_in), uni(ks[1], (1, h1), d_in),
            uni(ks[2], (h1, h2), h1), uni(ks[3], (1, h2), h1),
            uni(ks[4], (h2, d_out), h2), uni(ks[5], (1, d_out), h2))


def reference_forward(img, params):
    w1, b1, w2, b2, w3, b3 = params
    x = img.reshape(img.shape[0], -1)
    h = x @ w1 + b1
    h = jnp.where(h > 0, h, 0.2 * h)
    h = h @ w2 + b2
    h = jnp.where(h > 0, h, 0.2 * h)
    return h @ w3 + b3


if __name__ == "__main__":
    key = jax.random.PRNGKey(0)
    k_img, k_par = jax.random.split(key)

    # Small synthetic img_shape = (1, 16, 16) -> d_in = 256, batch = 8.
    B, C, H, W = 8, 1, 16, 16
    img = jax.random.normal(k_img, (B, C, H, W), dtype=jnp.float32)
    params = init_params(k_par, d_in=C * H * W)
    ref = np.asarray(reference_forward(img, params))

    # f32-operand path: near-exact match with the XLA reference.
    prep_f32 = prepare_params(params, compute_dtype=jnp.float32)
    out_f32 = jax.block_until_ready(discriminator_forward(img, prep_f32))
    np.testing.assert_allclose(np.asarray(out_f32), ref, rtol=1e-4, atol=1e-4)

    # Default bf16-operand path (perf config for v5e / v6e / v7x).
    prep_bf16 = prepare_params(params)            # bf16 matmul operands
    out_bf16 = jax.block_until_ready(discriminator_forward(img, prep_bf16))
    assert out_bf16.shape == (B, 1)
    np.testing.assert_allclose(np.asarray(out_bf16), ref, rtol=5e-2, atol=5e-2)

    # Exercise the K-split layer-1 accumulation and partial batch tiles at
    # small shapes (normally these only trigger for huge d_in / large B).
    B2 = 20
    img2 = jax.random.normal(k_img, (B2, C, H, W), dtype=jnp.float32)
    ref2 = np.asarray(reference_forward(img2, params))
    out_kt = jax.block_until_ready(
        discriminator_forward(img2, prep_f32, block_b=16, k_tile=128))
    np.testing.assert_allclose(np.asarray(out_kt), ref2, rtol=1e-4, atol=1e-4)

    print("KERNEL_OK")
</pallas_src>

<mosaic_0001>
module attributes {stable_mosaic.version = 11 : i64} {
  func.func @_disc_kernel(%arg0: i32, %arg1: i32, %arg2: memref<8x256xf32, #tpu.memory_space<vmem>>, %arg3: memref<256x512xf32, #tpu.memory_space<vmem>>, %arg4: memref<1x512xf32, #tpu.memory_space<vmem>>, %arg5: memref<512x256xf32, #tpu.memory_space<vmem>>, %arg6: memref<1x256xf32, #tpu.memory_space<vmem>>, %arg7: memref<256x128xf32, #tpu.memory_space<vmem>>, %arg8: memref<1x128xf32, #tpu.memory_space<vmem>>, %arg9: memref<8x128xf32, #tpu.memory_space<vmem>>, %arg10: memref<8x512xf32, #tpu.memory_space<vmem>>) attributes {dimension_semantics = [#tpu.dimension_semantics<parallel>, #tpu.dimension_semantics<arbitrary>], iteration_bounds = array<i64: 1, 1>, scalar_prefetch = 0 : i64, scratch_operands = 1 : i64, tpu.core_type = #tpu.core_type<tc>, window_params = [{transform_indices = @transform_0, window_bounds = array<i64: 8, 256>}, {pipeline_mode = #tpu.pipeline_mode<synchronous>, transform_indices = @transform_1, window_bounds = array<i64: 256, 512>}, {pipeline_mode = #tpu.pipeline_mode<synchronous>, transform_indices = @transform_2, window_bounds = array<i64: 1, 512>}, {pipeline_mode = #tpu.pipeline_mode<synchronous>, transform_indices = @transform_3, window_bounds = array<i64: 512, 256>}, {pipeline_mode = #tpu.pipeline_mode<synchronous>, transform_indices = @transform_4, window_bounds = array<i64: 1, 256>}, {pipeline_mode = #tpu.pipeline_mode<synchronous>, transform_indices = @transform_5, window_bounds = array<i64: 256, 128>}, {pipeline_mode = #tpu.pipeline_mode<synchronous>, transform_indices = @transform_6, window_bounds = array<i64: 1, 128>}, {transform_indices = @transform_7, window_bounds = array<i64: 8, 128>}]} {
    %c0_i32 = arith.constant 0 : i32
    %0 = arith.cmpi eq, %arg1, %c0_i32 : i32
    %1 = arith.extui %0 : i1 to i32
    %c0_i32_0 = arith.constant 0 : i32
    %2 = arith.cmpi ne, %1, %c0_i32_0 : i32
    scf.if %2 {
      %cst_10 = arith.constant 0.000000e+00 : f32
      %12 = vector.broadcast %cst_10 : f32 to vector<8x512xf32>
      %c0_11 = arith.constant 0 : index
      %c0_12 = arith.constant 0 : index
      %13 = vector.load %arg10[%c0_11, %c0_12] : memref<8x512xf32, #tpu.memory_space<vmem>>, vector<8x512xf32>
      tpu.vector_store %arg10[%c0_11, %c0_12], %12 {strides = array<i32>} : memref<8x512xf32, #tpu.memory_space<vmem>>, vector<8x512xf32>,
    } else {
    }
    %c0 = arith.constant 0 : index
    %c0_1 = arith.constant 0 : index
    %3 = vector.load %arg10[%c0, %c0_1] : memref<8x512xf32, #tpu.memory_space<vmem>>, vector<8x512xf32>
    %c0_2 = arith.constant 0 : index
    %c0_3 = arith.constant 0 : index
    %4 = vector.load %arg2[%c0_2, %c0_3] : memref<8x256xf32, #tpu.memory_space<vmem>>, vector<8x256xf32>
    %c0_4 = arith.constant 0 : index
    %c0_5 = arith.constant 0 : index
    %5 = vector.load %arg3[%c0_4, %c0_5] : memref<256x512xf32, #tpu.memory_space<vmem>>, vector<256x512xf32>
    %cst = arith.constant dense<0.000000e+00> : vector<8x512xf32>
    %6 = tpu.matmul %4, %5, %cst {dimension_numbers = #tpu.dot_dimension_numbers<[1], [0], [0], [1], [0, 0, 1, 1], [], []>} : vector<8x256xf32>, vector<256x512xf32>, vector<8x512xf32> -> vector<8x512xf32>
    %7 = arith.addf %3, %6 : vector<8x512xf32>
    %c0_6 = arith.constant 0 : index
    %c0_7 = arith.constant 0 : index
    %8 = vector.load %arg10[%c0_6, %c0_7] : memref<8x512xf32, #tpu.memory_space<vmem>>, vector<8x512xf32>
    tpu.vector_store %arg10[%c0_6, %c0_7], %7 {strides = array<i32>} : memref<8x512xf32, #tpu.memory_space<vmem>>, vector<8x512xf32>,
    %c0_i32_8 = arith.constant 0 : i32
    %9 = arith.cmpi eq, %arg1, %c0_i32_8 : i32
    %10 = arith.extui %9 : i1 to i32
    %c0_i32_9 = arith.constant 0 : i32
    %11 = arith.cmpi ne, %10, %c0_i32_9 : i32
    scf.if %11 {
      %c0_10 = arith.constant 0 : index
      %c0_11 = arith.constant 0 : index
      %12 = vector.load %arg10[%c0_10, %c0_11] : memref<8x512xf32, #tpu.memory_space<vmem>>, vector<8x512xf32>
      %c0_12 = arith.constant 0 : index
      %c0_13 = arith.constant 0 : index
      %13 = vector.load %arg4[%c0_12, %c0_13] : memref<1x512xf32, #tpu.memory_space<vmem>>, vector<1x512xf32>
      %14 = vector.broadcast %13 : vector<1x512xf32> to vector<8x512xf32>
      %15 = arith.addf %12, %14 : vector<8x512xf32>
      %cst_14 = arith.constant 0.000000e+00 : f32
      %16 = vector.broadcast %cst_14 : f32 to vector<8x512xf32>
      %17 = arith.cmpf ogt, %15, %16 : vector<8x512xf32>
      %cst_15 = arith.constant 2.000000e-01 : f32
      %18 = vector.broadcast %cst_15 : f32 to vector<8x512xf32>
      %19 = arith.mulf %18, %15 : vector<8x512xf32>
      %20 = arith.select %17, %15, %19 : vector<8x512xi1>, vector<8x512xf32>
      %c0_16 = arith.constant 0 : index
      %c0_17 = arith.constant 0 : index
      %21 = vector.load %arg5[%c0_16, %c0_17] : memref<512x256xf32, #tpu.memory_space<vmem>>, vector<512x256xf32>
      %cst_18 = arith.constant dense<0.000000e+00> : vector<8x256xf32>
      %22 = tpu.matmul %20, %21, %cst_18 {dimension_numbers = #tpu.dot_dimension_numbers<[1], [0], [0], [1], [0, 0, 1, 1], [], []>} : vector<8x512xf32>, vector<512x256xf32>, vector<8x256xf32> -> vector<8x256xf32>
      %c0_19 = arith.constant 0 : index
      %c0_20 = arith.constant 0 : index
      %23 = vector.load %arg6[%c0_19, %c0_20] : memref<1x256xf32, #tpu.memory_space<vmem>>, vector<1x256xf32>
      %24 = vector.broadcast %23 : vector<1x256xf32> to vector<8x256xf32>
      %25 = arith.addf %22, %24 : vector<8x256xf32>
      %cst_21 = arith.constant 0.000000e+00 : f32
      %26 = vector.broadcast %cst_21 : f32 to vector<8x256xf32>
      %27 = arith.cmpf ogt, %25, %26 : vector<8x256xf32>
      %cst_22 = arith.constant 2.000000e-01 : f32
      %28 = vector.broadcast %cst_22 : f32 to vector<8x256xf32>
      %29 = arith.mulf %28, %25 : vector<8x256xf32>
      %30 = arith.select %27, %25, %29 : vector<8x256xi1>, vector<8x256xf32>
      %c0_23 = arith.constant 0 : index
      %c0_24 = arith.constant 0 : index
      %31 = vector.load %arg7[%c0_23, %c0_24] : memref<256x128xf32, #tpu.memory_space<vmem>>, vector<256x128xf32>
      %cst_25 = arith.constant dense<0.000000e+00> : vector<8x128xf32>
      %32 = tpu.matmul %30, %31, %cst_25 {dimension_numbers = #tpu.dot_dimension_numbers<[1], [0], [0], [1], [0, 0, 1, 1], [], []>} : vector<8x256xf32>, vector<256x128xf32>, vector<8x128xf32> -> vector<8x128xf32>
      %c0_26 = arith.constant 0 : index
      %c0_27 = arith.constant 0 : index
      %33 = vector.load %arg8[%c0_26, %c0_27] : memref<1x128xf32, #tpu.memory_space<vmem>>, vector<1x128xf32>
      %34 = vector.broadcast %33 : vector<1x128xf32> to vector<8x128xf32>
      %35 = arith.addf %32, %34 : vector<8x128xf32>
      %c0_28 = arith.constant 0 : index
      %c0_29 = arith.constant 0 : index
      %36 = vector.load %arg9[%c0_28, %c0_29] : memref<8x128xf32, #tpu.memory_space<vmem>>, vector<8x128xf32>
      tpu.vector_store %arg9[%c0_28, %c0_29], %35 {strides = array<i32>} : memref<8x128xf32, #tpu.memory_space<vmem>>, vector<8x128xf32>,
    } else {
    }
    return
  }
  func.func @transform_0(%arg0: i32, %arg1: i32) -> (i32, i32) {
    %c0_i32 = arith.constant 0 : i32
    return %arg0, %arg1 : i32, i32
  }
  func.func @transform_1(%arg0: i32, %arg1: i32) -> (i32, i32) {
    %c0_i32 = arith.constant 0 : i32
    %c0_i32_0 = arith.constant 0 : i32
    %c0_i32_1 = arith.constant 0 : i32
    return %c0_i32, %c0_i32_0 : i32, i32
  }
  func.func @transform_2(%arg0: i32, %arg1: i32) -> (i32, i32) {
    %c0_i32 = arith.constant 0 : i32
    %c0_i32_0 = arith.constant 0 : i32
    %c0_i32_1 = arith.constant 0 : i32
    return %c0_i32, %c0_i32_0 : i32, i32
  }
  func.func @transform_3(%arg0: i32, %arg1: i32) -> (i32, i32) {
    %c0_i32 = arith.constant 0 : i32
    %c0_i32_0 = arith.constant 0 : i32
    %c0_i32_1 = arith.constant 0 : i32
    return %c0_i32, %c0_i32_0 : i32, i32
  }
  func.func @transform_4(%arg0: i32, %arg1: i32) -> (i32, i32) {
    %c0_i32 = arith.constant 0 : i32
    %c0_i32_0 = arith.constant 0 : i32
    %c0_i32_1 = arith.constant 0 : i32
    return %c0_i32, %c0_i32_0 : i32, i32
  }
  func.func @transform_5(%arg0: i32, %arg1: i32) -> (i32, i32) {
    %c0_i32 = arith.constant 0 : i32
    %c0_i32_0 = arith.constant 0 : i32
    %c0_i32_1 = arith.constant 0 : i32
    return %c0_i32, %c0_i32_0 : i32, i32
  }
  func.func @transform_6(%arg0: i32, %arg1: i32) -> (i32, i32) {
    %c0_i32 = arith.constant 0 : i32
    %c0_i32_0 = arith.constant 0 : i32
    %c0_i32_1 = arith.constant 0 : i32
    return %c0_i32, %c0_i32_0 : i32, i32
  }
  func.func @transform_7(%arg0: i32, %arg1: i32) -> (i32, i32) {
    %c0_i32 = arith.constant 0 : i32
    %c0_i32_0 = arith.constant 0 : i32
    return %arg0, %c0_i32 : i32, i32
  }
}

</mosaic_0001>

<bundles_post_ra>
// kernel: discriminator_forward.1
= control target key start
LH: loop header
LB: loop body
LE: loop exit
PB: predicated region body
PF: predicated region fallthrough
CT: control target
= control target key end

     0   :  { %12 = vsyncpa [#allocation4], 0  ;;  %s973_s0 = inlined_call_operand.vmem [shape: f32[8,256], index: 0, kind: input, shape index: {}]   ;;  %s974_s1 = inlined_call_operand.hbm [shape: f32[256,512], index: 1, kind: input, shape index: {}]   ;;  %s975_s2 = inlined_call_operand.vmem [shape: f32[1,512], index: 2, kind: input, shape index: {}]   ;;  %s976_s3 = inlined_call_operand.hbm [shape: f32[512,256], index: 3, kind: input, shape index: {}]   ;;  %s977_s4 = inlined_call_operand.vmem [shape: f32[1,256], index: 4, kind: input, shape index: {}]   ;;  %s978_s5 = inlined_call_operand.hbm [shape: f32[256,128], index: 5, kind: input, shape index: {}]   ;;  %s979_s6 = inlined_call_operand.vmem [shape: f32[1,128], index: 6, kind: input, shape index: {}]   ;;  %s980_s7 = inlined_call_operand.vmem [shape: f32[8,128], index: 7, kind: output, shape index: {}]  }
   0x1   :  { %13 = vsyncpa [#allocation6], 0  ;;  %s35_s26 = sshll.u32 %s976_s3, 4  ;;  %s885_s27 = smov [#allocation5]   ;;  %s36_s26 = int_to_ptr.hbm [resolvable:$true] %s35_s26 }
   0x2   :  { %s37_s28 = sshll.u32 %s885_s27, 4  ;;  %s20_s8 = sshll.u32 %s974_s1, 4  ;;  %s38_s28 = int_to_ptr.vmem [resolvable:$true] %s37_s28  ;;  %s21_s8 = int_to_ptr.hbm [resolvable:$true] %s20_s8 }
   0x3   :  { %s886_s9 = smov 256   ;;  %s887_s10 = smov 16  }
   0x4   :  { %43 = dma.hbm_to_vmem [thread:$0]  %s36_s26, 16384, %s38_s28, [#allocation6], %s886_s9, %s886_s9, %s887_s10  }
   0x5   :  { %s888_s11 = smov [#allocation3]   ;;  %s889_s13 = smov 512  }
   0x6   :  { %s22_s12 = sshll.u32 %s888_s11, 4  ;;  %s890_s14 = smov 32   ;;  %s23_s12 = int_to_ptr.vmem [resolvable:$true] %s22_s12 }
   0x7   :  { %28 = dma.hbm_to_vmem [thread:$0]  %s21_s8, 16384, %s23_s12, [#allocation4], %s889_s13, %s889_s13, %s890_s14  }
   0x8   :  { %s50_s16 = sshll.u32 %s978_s5, 4  ;;  %s891_s17 = smov [#allocation7]   ;;  %s51_s16 = int_to_ptr.hbm [resolvable:$true] %s50_s16 }
   0x9   :  { %s52_s18 = sshll.u32 %s891_s17, 4  ;;  %s892_s19 = smov 128   ;;  %s53_s18 = int_to_ptr.vmem [resolvable:$true] %s52_s18 }
   0xa   :  { %s893_s1 = smov 8  }
   0xb   :  { %58 = dma.hbm_to_vmem [thread:$0]  %s51_s16, 4096, %s53_s18, [#allocation6], %s892_s19, %s892_s19, %s893_s1  }
   0xc   :  { %881 = dma.done.wait [#allocation4], 16384  }
   0xd   :  { %882 = vsyncadd [#allocation4], 4294950912 }
   0xe   :  { %883 = dma.done.wait [#allocation6], 20480  }
   0xf   :  { %884 = vsyncadd [#allocation6], 4294946816  ;;  %v147_v0 = vld [vmem:[#allocation3 + $0x1e0] sm:$0xff]  ;;  %v148_v2 = vld [vmem:[#allocation3 + $0x1e8] sm:$0xff] }
  0x10   :  { %v211_v1 = vld [vmem:[#allocation3 + $0x3e0] sm:$0xff]  ;;  %215 = vmatpush.msra.mxu0 %v147_v0  ;;  %v212_v3 = vld [vmem:[#allocation3 + $0x3e8] sm:$0xff]  ;;  %255 = vmatpush.msra.mxu2 %v148_v2  ;;  %v149_v0 = vld [vmem:[#allocation3 + $0x1f0] sm:$0xff] }
  0x11   :  { %235 = vmatpush.msra.mxu1 %v211_v1  ;;  %v143_v4 = vld [vmem:[#allocation3 + $0x1c0] sm:$0xff]  ;;  %275 = vmatpush.msra.mxu3 %v212_v3  ;;  %v144_v6 = vld [vmem:[#allocation3 + $0x1c8] sm:$0xff]  ;;  %v213_v1 = vld [vmem:[#allocation3 + $0x3f0] sm:$0xff] }
  0x12   :  { %v207_v5 = vld [vmem:[#allocation3 + $0x3c0] sm:$0xff]  ;;  %v208_v7 = vld [vmem:[#allocation3 + $0x3c8] sm:$0xff]  ;;  %216 = vmatpush.msra.mxu0 %v143_v4  ;;  %256 = vmatpush.msra.mxu2 %v144_v6  ;;  %v150_v2 = vld [vmem:[#allocation3 + $0x1f8] sm:$0xff] }
  0x13   :  { %v139_v8 = vld [vmem:[#allocation3 + $0x1a0] sm:$0xff]  ;;  %236 = vmatpush.msra.mxu1 %v207_v5  ;;  %v140_v10 = vld [vmem:[#allocation3 + $0x1a8] sm:$0xff]  ;;  %276 = vmatpush.msra.mxu3 %v208_v7  ;;  %v214_v3 = vld [vmem:[#allocation3 + $0x3f8] sm:$0xff] }
  0x14   :  { %v203_v9 = vld [vmem:[#allocation3 + $0x3a0] sm:$0xff]  ;;  %v204_v11 = vld [vmem:[#allocation3 + $0x3a8] sm:$0xff]  ;;  %217 = vmatpush.msra.mxu0 %v139_v8  ;;  %257 = vmatpush.msra.mxu2 %v140_v10  ;;  %v145_v4 = vld [vmem:[#allocation3 + $0x1d0] sm:$0xff] }
  0x15   :  { %v135_v12 = vld [vmem:[#allocation3 + $0x180] sm:$0xff]  ;;  %237 = vmatpush.msra.mxu1 %v203_v9  ;;  %v136_v14 = vld [vmem:[#allocation3 + $0x188] sm:$0xff]  ;;  %277 = vmatpush.msra.mxu3 %v204_v11  ;;  %v209_v5 = vld [vmem:[#allocation3 + $0x3d0] sm:$0xff] }
  0x16   :  { %v199_v13 = vld [vmem:[#allocation3 + $0x380] sm:$0xff]  ;;  %v200_v15 = vld [vmem:[#allocation3 + $0x388] sm:$0xff]  ;;  %218 = vmatpush.msra.mxu0 %v135_v12  ;;  %258 = vmatpush.msra.mxu2 %v136_v14  ;;  %v146_v6 = vld [vmem:[#allocation3 + $0x1d8] sm:$0xff] }
  0x17   :  { %v131_v16 = vld [vmem:[#allocation3 + $0x160] sm:$0xff]  ;;  %238 = vmatpush.msra.mxu1 %v199_v13  ;;  %v132_v18 = vld [vmem:[#allocation3 + $0x168] sm:$0xff]  ;;  %278 = vmatpush.msra.mxu3 %v200_v15  ;;  %v210_v7 = vld [vmem:[#allocation3 + $0x3d8] sm:$0xff] }
  0x18   :  { %v195_v17 = vld [vmem:[#allocation3 + $0x360] sm:$0xff]  ;;  %v196_v19 = vld [vmem:[#allocation3 + $0x368] sm:$0xff]  ;;  %219 = vmatpush.msra.mxu0 %v131_v16  ;;  %259 = vmatpush.msra.mxu2 %v132_v18  ;;  %v141_v8 = vld [vmem:[#allocation3 + $0x1b0] sm:$0xff] }
  0x19   :  { %v127_v20 = vld [vmem:[#allocation3 + $0x140] sm:$0xff]  ;;  %239 = vmatpush.msra.mxu1 %v195_v17  ;;  %v128_v22 = vld [vmem:[#allocation3 + $0x148] sm:$0xff]  ;;  %279 = vmatpush.msra.mxu3 %v196_v19  ;;  %v205_v9 = vld [vmem:[#allocation3 + $0x3b0] sm:$0xff] }
  0x1a   :  { %v191_v21 = vld [vmem:[#allocation3 + $0x340] sm:$0xff]  ;;  %v192_v23 = vld [vmem:[#allocation3 + $0x348] sm:$0xff]  ;;  %220 = vmatpush.msra.mxu0 %v127_v20  ;;  %260 = vmatpush.msra.mxu2 %v128_v22  ;;  %v142_v10 = vld [vmem:[#allocation3 + $0x1b8] sm:$0xff] }
  0x1b   :  { %v123_v24 = vld [vmem:[#allocation3 + $0x120] sm:$0xff]  ;;  %240 = vmatpush.msra.mxu1 %v191_v21  ;;  %v124_v26 = vld [vmem:[#allocation3 + $0x128] sm:$0xff]  ;;  %280 = vmatpush.msra.mxu3 %v192_v23  ;;  %v206_v11 = vld [vmem:[#allocation3 + $0x3b8] sm:$0xff] }
  0x1c   :  { %v187_v25 = vld [vmem:[#allocation3 + $0x320] sm:$0xff]  ;;  %v188_v27 = vld [vmem:[#allocation3 + $0x328] sm:$0xff]  ;;  %221 = vmatpush.msra.mxu0 %v123_v24  ;;  %261 = vmatpush.msra.mxu2 %v124_v26  ;;  %v137_v12 = vld [vmem:[#allocation3 + $0x190] sm:$0xff] }
  0x1d   :  { %v119_v28 = vld [vmem:[#allocation3 + $0x100] sm:$0xff]  ;;  %241 = vmatpush.msra.mxu1 %v187_v25  ;;  %v120_v30 = vld [vmem:[#allocation3 + $0x108] sm:$0xff]  ;;  %281 = vmatpush.msra.mxu3 %v188_v27  ;;  %v201_v13 = vld [vmem:[#allocation3 + $0x390] sm:$0xff] }
  0x1e   :  { %v183_v29 = vld [vmem:[#allocation3 + $0x300] sm:$0xff]  ;;  %v184_v31 = vld [vmem:[#allocation3 + $0x308] sm:$0xff]  ;;  %222 = vmatpush.msra.mxu0 %v119_v28  ;;  %262 = vmatpush.msra.mxu2 %v120_v30  ;;  %v138_v14 = vld [vmem:[#allocation3 + $0x198] sm:$0xff] }
  0x1f   :  { %v115_v32 = vld [vmem:[#allocation3 + $0xe0] sm:$0xff]  ;;  %242 = vmatpush.msra.mxu1 %v183_v29  ;;  %v116_v34 = vld [vmem:[#allocation3 + $0xe8] sm:$0xff]  ;;  %282 = vmatpush.msra.mxu3 %v184_v31  ;;  %v202_v15 = vld [vmem:[#allocation3 + $0x398] sm:$0xff] }
  0x20   :  { %v179_v33 = vld [vmem:[#allocation3 + $0x2e0] sm:$0xff]  ;;  %v180_v35 = vld [vmem:[#allocation3 + $0x2e8] sm:$0xff]  ;;  %223 = vmatpush.msra.mxu0 %v115_v32  ;;  %263 = vmatpush.msra.mxu2 %v116_v34  ;;  %v133_v16 = vld [vmem:[#allocation3 + $0x170] sm:$0xff] }
  0x21   :  { %v111_v36 = vld [vmem:[#allocation3 + $0xc0] sm:$0xff]  ;;  %243 = vmatpush.msra.mxu1 %v179_v33  ;;  %v112_v38 = vld [vmem:[#allocation3 + $0xc8] sm:$0xff]  ;;  %283 = vmatpush.msra.mxu3 %v180_v35  ;;  %v197_v17 = vld [vmem:[#allocation3 + $0x370] sm:$0xff] }
  0x22   :  { %v175_v37 = vld [vmem:[#allocation3 + $0x2c0] sm:$0xff]  ;;  %v176_v39 = vld [vmem:[#allocation3 + $0x2c8] sm:$0xff]  ;;  %224 = vmatpush.msra.mxu0 %v111_v36  ;;  %264 = vmatpush.msra.mxu2 %v112_v38  ;;  %v134_v18 = vld [vmem:[#allocation3 + $0x178] sm:$0xff] }
  0x23   :  { %v107_v40 = vld [vmem:[#allocation3 + $0xa0] sm:$0xff]  ;;  %244 = vmatpush.msra.mxu1 %v175_v37  ;;  %v108_v42 = vld [vmem:[#allocation3 + $0xa8] sm:$0xff]  ;;  %284 = vmatpush.msra.mxu3 %v176_v39  ;;  %v198_v19 = vld [vmem:[#allocation3 + $0x378] sm:$0xff] }
  0x24   :  { %v171_v41 = vld [vmem:[#allocation3 + $0x2a0] sm:$0xff]  ;;  %v172_v43 = vld [vmem:[#allocation3 + $0x2a8] sm:$0xff]  ;;  %225 = vmatpush.msra.mxu0 %v107_v40  ;;  %265 = vmatpush.msra.mxu2 %v108_v42  ;;  %v129_v20 = vld [vmem:[#allocation3 + $0x150] sm:$0xff] }
  0x25   :  { %v103_v44 = vld [vmem:[#allocation3 + $0x80] sm:$0xff]  ;;  %245 = vmatpush.msra.mxu1 %v171_v41  ;;  %v104_v46 = vld [vmem:[#allocation3 + $0x88] sm:$0xff]  ;;  %285 = vmatpush.msra.mxu3 %v172_v43  ;;  %v193_v21 = vld [vmem:[#allocation3 + $0x350] sm:$0xff] }
  0x26   :  { %v167_v45 = vld [vmem:[#allocation3 + $0x280] sm:$0xff]  ;;  %v168_v47 = vld [vmem:[#allocation3 + $0x288] sm:$0xff]  ;;  %226 = vmatpush.msra.mxu0 %v103_v44  ;;  %266 = vmatpush.msra.mxu2 %v104_v46  ;;  %v130_v22 = vld [vmem:[#allocation3 + $0x158] sm:$0xff] }
  0x27   :  { %v99_v48 = vld [vmem:[#allocation3 + $0x60] sm:$0xff]  ;;  %246 = vmatpush.msra.mxu1 %v167_v45  ;;  %v100_v50 = vld [vmem:[#allocation3 + $0x68] sm:$0xff]  ;;  %286 = vmatpush.msra.mxu3 %v168_v47  ;;  %v194_v23 = vld [vmem:[#allocation3 + $0x358] sm:$0xff] }
  0x28   :  { %v163_v49 = vld [vmem:[#allocation3 + $0x260] sm:$0xff]  ;;  %v164_v51 = vld [vmem:[#allocation3 + $0x268] sm:$0xff]  ;;  %227 = vmatpush.msra.mxu0 %v99_v48  ;;  %267 = vmatpush.msra.mxu2 %v100_v50  ;;  %v125_v24 = vld [vmem:[#allocation3 + $0x130] sm:$0xff] }
  0x29   :  { %v95_v52 = vld [vmem:[#allocation3 + $0x40] sm:$0xff]  ;;  %247 = vmatpush.msra.mxu1 %v163_v49  ;;  %v96_v54 = vld [vmem:[#allocation3 + $0x48] sm:$0xff]  ;;  %287 = vmatpush.msra.mxu3 %v164_v51  ;;  %v189_v25 = vld [vmem:[#allocation3 + $0x330] sm:$0xff] }
  0x2a   :  { %v159_v53 = vld [vmem:[#allocation3 + $0x240] sm:$0xff]  ;;  %v160_v55 = vld [vmem:[#allocation3 + $0x248] sm:$0xff]  ;;  %228 = vmatpush.msra.mxu0 %v95_v52  ;;  %268 = vmatpush.msra.mxu2 %v96_v54  ;;  %v126_v26 = vld [vmem:[#allocation3 + $0x138] sm:$0xff] }
  0x2b   :  { %v91_v56 = vld [vmem:[#allocation3 + $0x20] sm:$0xff]  ;;  %248 = vmatpush.msra.mxu1 %v159_v53  ;;  %v92_v58 = vld [vmem:[#allocation3 + $0x28] sm:$0xff]  ;;  %288 = vmatpush.msra.mxu3 %v160_v55  ;;  %v190_v27 = vld [vmem:[#allocation3 + $0x338] sm:$0xff] }
  0x2c   :  { %v155_v57 = vld [vmem:[#allocation3 + $0x220] sm:$0xff]  ;;  %v156_v59 = vld [vmem:[#allocation3 + $0x228] sm:$0xff]  ;;  %229 = vmatpush.msra.mxu0 %v91_v56  ;;  %269 = vmatpush.msra.mxu2 %v92_v58  ;;  %v121_v30 = vld [vmem:[#allocation3 + $0x110] sm:$0xff] }
  0x2d   :  { %v87_v60 = vld [vmem:[#allocation3] sm:$0xff]  ;;  %249 = vmatpush.msra.mxu1 %v155_v57  ;;  %v88_v62 = vld [vmem:[#allocation3 + $0x8] sm:$0xff]  ;;  %289 = vmatpush.msra.mxu3 %v156_v59  ;;  %v185_v31 = vld [vmem:[#allocation3 + $0x310] sm:$0xff] }
  0x2e   :  { %v151_v61 = vld [vmem:[#allocation3 + $0x200] sm:$0xff]  ;;  %v152_v63 = vld [vmem:[#allocation3 + $0x208] sm:$0xff]  ;;  %230 = vmatpush.msra.mxu0 %v87_v60  ;;  %270 = vmatpush.msra.mxu2 %v88_v62  ;;  %v122_v32 = vld [vmem:[#allocation3 + $0x118] sm:$0xff] }
  0x2f   :  { %250 = vmatpush.msra.mxu1 %v151_v61  ;;  %290 = vmatpush.msra.mxu3 %v152_v63  ;;  %v946_v28 = vld [vmem:[%s973_s0] sm:$0xff]  ;;  %v951_v29 = vld [vmem:[%s973_s0 + $0x8] sm:$0xff]  ;;  %v186_v33 = vld [vmem:[#allocation3 + $0x318] sm:$0xff] }
  0x30   :  { %295 = vmatpush.msrb.mxu0 %v149_v0  ;;  %335 = vmatpush.msrb.mxu2 %v150_v2  ;;  %v117_v34 = vld [vmem:[#allocation3 + $0xf0] sm:$0xff]  ;;  %v118_v36 = vld [vmem:[#allocation3 + $0xf8] sm:$0xff] }
  0x31   :  { %315 = vmatpush.msrb.mxu1 %v213_v1  ;;  %355 = vmatpush.msrb.mxu3 %v214_v3  ;;  %v181_v35 = vld [vmem:[#allocation3 + $0x2f0] sm:$0xff]  ;;  %v182_v37 = vld [vmem:[#allocation3 + $0x2f8] sm:$0xff] }
  0x32   :  { %296 = vmatpush.msrb.mxu0 %v145_v4  ;;  %336 = vmatpush.msrb.mxu2 %v146_v6  ;;  %v113_v38 = vld [vmem:[#allocation3 + $0xd0] sm:$0xff]  ;;  %v114_v40 = vld [vmem:[#allocation3 + $0xd8] sm:$0xff]  ;;  %v444_v6 = vld [vmem:[#allocation5 + $0xe0] sm:$0xff] }
  0x33   :  { %316 = vmatpush.msrb.mxu1 %v209_v5  ;;  %356 = vmatpush.msrb.mxu3 %v210_v7  ;;  %v177_v39 = vld [vmem:[#allocation3 + $0x2d0] sm:$0xff]  ;;  %v178_v41 = vld [vmem:[#allocation3 + $0x2d8] sm:$0xff]  ;;  %v476_v7 = vld [vmem:[#allocation5 + $0x1e0] sm:$0xff] }
  0x34   :  { %297 = vmatpush.msrb.mxu0 %v141_v8  ;;  %337 = vmatpush.msrb.mxu2 %v142_v10  ;;  %v109_v42 = vld [vmem:[#allocation3 + $0xb0] sm:$0xff]  ;;  %v110_v44 = vld [vmem:[#allocation3 + $0xb8] sm:$0xff]  ;;  %v508_v8 = vld [vmem:[#allocation5 + $0x2e0] sm:$0xff] }
  0x35   :  { %317 = vmatpush.msrb.mxu1 %v205_v9  ;;  %357 = vmatpush.msrb.mxu3 %v206_v11  ;;  %v173_v43 = vld [vmem:[#allocation3 + $0x2b0] sm:$0xff]  ;;  %v174_v45 = vld [vmem:[#allocation3 + $0x2b8] sm:$0xff]  ;;  %v540_v9 = vld [vmem:[#allocation5 + $0x3e0] sm:$0xff] }
  0x36   :  { %298 = vmatpush.msrb.mxu0 %v137_v12  ;;  %338 = vmatpush.msrb.mxu2 %v138_v14  ;;  %v105_v46 = vld [vmem:[#allocation3 + $0x90] sm:$0xff]  ;;  %v106_v48 = vld [vmem:[#allocation3 + $0x98] sm:$0xff]  ;;  %v440_v14 = vld [vmem:[#allocation5 + $0xc0] sm:$0xff] }
  0x37   :  { %318 = vmatpush.msrb.mxu1 %v201_v13  ;;  %358 = vmatpush.msrb.mxu3 %v202_v15  ;;  %v169_v47 = vld [vmem:[#allocation3 + $0x290] sm:$0xff]  ;;  %v170_v49 = vld [vmem:[#allocation3 + $0x298] sm:$0xff]  ;;  %v472_v15 = vld [vmem:[#allocation5 + $0x1c0] sm:$0xff] }
  0x38   :  { %299 = vmatpush.msrb.mxu0 %v133_v16  ;;  %339 = vmatpush.msrb.mxu2 %v134_v18  ;;  %v101_v50 = vld [vmem:[#allocation3 + $0x70] sm:$0xff]  ;;  %v102_v52 = vld [vmem:[#allocation3 + $0x78] sm:$0xff]  ;;  %v504_v16 = vld [vmem:[#allocation5 + $0x2c0] sm:$0xff] }
  0x39   :  { %319 = vmatpush.msrb.mxu1 %v197_v17  ;;  %359 = vmatpush.msrb.mxu3 %v198_v19  ;;  %v165_v51 = vld [vmem:[#allocation3 + $0x270] sm:$0xff]  ;;  %v166_v53 = vld [vmem:[#allocation3 + $0x278] sm:$0xff]  ;;  %v536_v17 = vld [vmem:[#allocation5 + $0x3c0] sm:$0xff] }
  0x3a   :  { %300 = vmatpush.msrb.mxu0 %v129_v20  ;;  %340 = vmatpush.msrb.mxu2 %v130_v22  ;;  %v97_v54 = vld [vmem:[#allocation3 + $0x50] sm:$0xff]  ;;  %v98_v56 = vld [vmem:[#allocation3 + $0x58] sm:$0xff]  ;;  %v436_v22 = vld [vmem:[#allocation5 + $0xa0] sm:$0xff] }
  0x3b   :  { %320 = vmatpush.msrb.mxu1 %v193_v21  ;;  %360 = vmatpush.msrb.mxu3 %v194_v23  ;;  %v161_v55 = vld [vmem:[#allocation3 + $0x250] sm:$0xff]  ;;  %v162_v57 = vld [vmem:[#allocation3 + $0x258] sm:$0xff]  ;;  %v468_v23 = vld [vmem:[#allocation5 + $0x1a0] sm:$0xff] }
  0x3c   :  { %301 = vmatpush.msrb.mxu0 %v125_v24  ;;  %341 = vmatpush.msrb.mxu2 %v126_v26  ;;  %v93_v58 = vld [vmem:[#allocation3 + $0x30] sm:$0xff]  ;;  %v94_v60 = vld [vmem:[#allocation3 + $0x38] sm:$0xff]  ;;  %v500_v24 = vld [vmem:[#allocation5 + $0x2a0] sm:$0xff] }
  0x3d   :  { %321 = vmatpush.msrb.mxu1 %v189_v25  ;;  %361 = vmatpush.msrb.mxu3 %v190_v27  ;;  %v157_v59 = vld [vmem:[#allocation3 + $0x230] sm:$0xff]  ;;  %v158_v61 = vld [vmem:[#allocation3 + $0x238] sm:$0xff]  ;;  %v532_v25 = vld [vmem:[#allocation5 + $0x3a0] sm:$0xff] }
  0x3e   :  { %271 = vmatmul.f32.vlgmr.msra.gmra.mxu2 %v946_v28  ;;  %291 = vmatmul.f32.vlgmr.msra.gmra.mxu3 %v951_v29  ;;  %v89_v62 = vld [vmem:[#allocation3 + $0x10] sm:$0xff]  ;;  %v90_v0 = vld [vmem:[#allocation3 + $0x18] sm:$0xff] }
  0x3f   :  { %302 = vmatpush.msrb.mxu0 %v121_v30  ;;  %322 = vmatpush.msrb.mxu1 %v185_v31  ;;  %v153_v63 = vld [vmem:[#allocation3 + $0x210] sm:$0xff]  ;;  %v154_v1 = vld [vmem:[#allocation3 + $0x218] sm:$0xff]  ;;  %v432_v30 = vld [vmem:[#allocation5 + $0x80] sm:$0xff] }
  0x40   :  { %342 = vmatpush.msrb.mxu2 %v122_v32  ;;  %362 = vmatpush.msrb.mxu3 %v186_v33  ;;  %v446_v2 = vld [vmem:[#allocation5 + $0xf0] sm:$0xff]  ;;  %v464_v31 = vld [vmem:[#allocation5 + $0x180] sm:$0xff] }
  0x41   :  { %303 = vmatpush.msrb.mxu0 %v117_v34  ;;  %323 = vmatpush.msrb.mxu1 %v181_v35  ;;  %v478_v3 = vld [vmem:[#allocation5 + $0x1f0] sm:$0xff]  ;;  %v496_v32 = vld [vmem:[#allocation5 + $0x280] sm:$0xff] }
  0x42   :  { %343 = vmatpush.msrb.mxu2 %v118_v36  ;;  %363 = vmatpush.msrb.mxu3 %v182_v37  ;;  %v510_v4 = vld [vmem:[#allocation5 + $0x2f0] sm:$0xff]  ;;  %v528_v33 = vld [vmem:[#allocation5 + $0x380] sm:$0xff] }
  0x43   :  { %231 = vmatmul.f32.vlgmr.msra.gmra.mxu0 %v946_v28  ;;  %251 = vmatmul.f32.vlgmr.msra.gmra.mxu1 %v951_v29  ;;  %v542_v5 = vld [vmem:[#allocation5 + $0x3f0] sm:$0xff] }
  0x44   :  { %304 = vmatpush.msrb.mxu0 %v113_v38  ;;  %324 = vmatpush.msrb.mxu1 %v177_v39  ;;  %v442_v10 = vld [vmem:[#allocation5 + $0xd0] sm:$0xff]  ;;  %v428_v38 = vld [vmem:[#allocation5 + $0x60] sm:$0xff] }
  0x45   :  { %344 = vmatpush.msrb.mxu2 %v114_v40  ;;  %364 = vmatpush.msrb.mxu3 %v178_v41  ;;  %v474_v11 = vld [vmem:[#allocation5 + $0x1d0] sm:$0xff]  ;;  %v460_v39 = vld [vmem:[#allocation5 + $0x160] sm:$0xff] }
  0x46   :  { %305 = vmatpush.msrb.mxu0 %v109_v42  ;;  %325 = vmatpush.msrb.mxu1 %v173_v43  ;;  %v506_v12 = vld [vmem:[#allocation5 + $0x2d0] sm:$0xff]  ;;  %v492_v40 = vld [vmem:[#allocation5 + $0x260] sm:$0xff] }
  0x47   :  { %345 = vmatpush.msrb.mxu2 %v110_v44  ;;  %365 = vmatpush.msrb.mxu3 %v174_v45  ;;  %v538_v13 = vld [vmem:[#allocation5 + $0x3d0] sm:$0xff]  ;;  %v524_v41 = vld [vmem:[#allocation5 + $0x360] sm:$0xff] }
  0x48   :  { %306 = vmatpush.msrb.mxu0 %v105_v46  ;;  %326 = vmatpush.msrb.mxu1 %v169_v47  ;;  %v438_v18 = vld [vmem:[#allocation5 + $0xb0] sm:$0xff]  ;;  %v424_v46 = vld [vmem:[#allocation5 + $0x40] sm:$0xff] }
  0x49   :  { %346 = vmatpush.msrb.mxu2 %v106_v48  ;;  %366 = vmatpush.msrb.mxu3 %v170_v49  ;;  %v470_v19 = vld [vmem:[#allocation5 + $0x1b0] sm:$0xff]  ;;  %v456_v47 = vld [vmem:[#allocation5 + $0x140] sm:$0xff] }
  0x4a   :  { %307 = vmatpush.msrb.mxu0 %v101_v50  ;;  %327 = vmatpush.msrb.mxu1 %v165_v51  ;;  %v502_v20 = vld [vmem:[#allocation5 + $0x2b0] sm:$0xff]  ;;  %v488_v48 = vld [vmem:[#allocation5 + $0x240] sm:$0xff] }
  0x4b   :  { %347 = vmatpush.msrb.mxu2 %v102_v52  ;;  %367 = vmatpush.msrb.mxu3 %v166_v53  ;;  %v534_v21 = vld [vmem:[#allocation5 + $0x3b0] sm:$0xff]  ;;  %v520_v49 = vld [vmem:[#allocation5 + $0x340] sm:$0xff] }
  0x4c   :  { %308 = vmatpush.msrb.mxu0 %v97_v54  ;;  %328 = vmatpush.msrb.mxu1 %v161_v55  ;;  %v434_v26 = vld [vmem:[#allocation5 + $0x90] sm:$0xff]  ;;  %v420_v54 = vld [vmem:[#allocation5 + $0x20] sm:$0xff] }
  0x4d   :  { %348 = vmatpush.msrb.mxu2 %v98_v56  ;;  %368 = vmatpush.msrb.mxu3 %v162_v57  ;;  %v466_v27 = vld [vmem:[#allocation5 + $0x190] sm:$0xff]  ;;  %v452_v55 = vld [vmem:[#allocation5 + $0x120] sm:$0xff] }
  0x4e   :  { %309 = vmatpush.msrb.mxu0 %v93_v58  ;;  %329 = vmatpush.msrb.mxu1 %v157_v59  ;;  %v430_v34 = vld [vmem:[#allocation5 + $0x70] sm:$0xff]  ;;  %v484_v56 = vld [vmem:[#allocation5 + $0x220] sm:$0xff] }
  0x4f   :  { %349 = vmatpush.msrb.mxu2 %v94_v60  ;;  %369 = vmatpush.msrb.mxu3 %v158_v61  ;;  %v462_v35 = vld [vmem:[#allocation5 + $0x170] sm:$0xff]  ;;  %v416_v60 = vld [vmem:[#allocation5] sm:$0xff] }
  0x50   :  { %310 = vmatpush.msrb.mxu0 %v89_v62  ;;  %330 = vmatpush.msrb.mxu1 %v153_v63  ;;  %v494_v36 = vld [vmem:[#allocation5 + $0x270] sm:$0xff]  ;;  %v448_v61 = vld [vmem:[#allocation5 + $0x100] sm:$0xff]  ;;  %v447_v62 = vld [vmem:[#allocation5 + $0xf8] sm:$0xff] }
  0x51   :  { %350 = vmatpush.msrb.mxu2 %v90_v0  ;;  %370 = vmatpush.msrb.mxu3 %v154_v1  ;;  %v526_v37 = vld [vmem:[#allocation5 + $0x370] sm:$0xff]  ;;  %v479_v63 = vld [vmem:[#allocation5 + $0x1f8] sm:$0xff]  ;;  %v480_v0 = vld [vmem:[#allocation5 + $0x200] sm:$0xff] }
  0x52   :  { %311 = vmatmul.f32.vlgmr.msrb.gmra.mxu0 %v946_v28  ;;  %331 = vmatmul.f32.vlgmr.msrb.gmra.mxu1 %v951_v29  ;;  %v426_v42 = vld [vmem:[#allocation5 + $0x50] sm:$0xff]  ;;  %v445_v1 = vld [vmem:[#allocation5 + $0xe8] sm:$0xff] }
  0x53   :  { %351 = vmatmul.f32.vlgmr.msrb.gmra.mxu2 %v946_v28  ;;  %371 = vmatmul.f32.vlgmr.msrb.gmra.mxu3 %v951_v29  ;;  %v498_v28 = vld [vmem:[#allocation5 + $0x290] sm:$0xff] }
  0x54   :  { %550 = vmatpush.msra.mxu0 %v446_v2  ;;  %570 = vmatpush.msra.mxu1 %v478_v3  ;;  %v530_v29 = vld [vmem:[#allocation5 + $0x390] sm:$0xff]  ;;  %v477_v2 = vld [vmem:[#allocation5 + $0x1e8] sm:$0xff]  ;;  %v511_v3 = vld [vmem:[#allocation5 + $0x2f8] sm:$0xff] }
  0x55   :  { %590 = vmatpush.msra.mxu2 %v510_v4  ;;  %610 = vmatpush.msra.mxu3 %v542_v5  ;;  %v458_v43 = vld [vmem:[#allocation5 + $0x150] sm:$0xff]  ;;  %v443_v4 = vld [vmem:[#allocation5 + $0xd8] sm:$0xff] }
  0x56   :  { %551 = vmatpush.msra.mxu0 %v444_v6  ;;  %571 = vmatpush.msra.mxu1 %v476_v7  ;;  %v490_v44 = vld [vmem:[#allocation5 + $0x250] sm:$0xff]  ;;  %v475_v5 = vld [vmem:[#allocation5 + $0x1d8] sm:$0xff]  ;;  %v441_v6 = vld [vmem:[#allocation5 + $0xc8] sm:$0xff] }
  0x57   :  { %591 = vmatpush.msra.mxu2 %v508_v8  ;;  %611 = vmatpush.msra.mxu3 %v540_v9  ;;  %v522_v45 = vld [vmem:[#allocation5 + $0x350] sm:$0xff]  ;;  %v473_v7 = vld [vmem:[#allocation5 + $0x1c8] sm:$0xff]  ;;  %v439_v8 = vld [vmem:[#allocation5 + $0xb8] sm:$0xff] }
  0x58   :  { %552 = vmatpush.msra.mxu0 %v442_v10  ;;  %572 = vmatpush.msra.mxu1 %v474_v11  ;;  %v422_v50 = vld [vmem:[#allocation5 + $0x30] sm:$0xff]  ;;  %v471_v9 = vld [vmem:[#allocation5 + $0x1b8] sm:$0xff]  ;;  %v437_v10 = vld [vmem:[#allocation5 + $0xa8] sm:$0xff] }
  0x59   :  { %592 = vmatpush.msra.mxu2 %v506_v12  ;;  %612 = vmatpush.msra.mxu3 %v538_v13  ;;  %v454_v51 = vld [vmem:[#allocation5 + $0x130] sm:$0xff]  ;;  %v469_v11 = vld [vmem:[#allocation5 + $0x1a8] sm:$0xff]  ;;  %v435_v12 = vld [vmem:[#allocation5 + $0x98] sm:$0xff] }
  0x5a   :  { %553 = vmatpush.msra.mxu0 %v440_v14  ;;  %573 = vmatpush.msra.mxu1 %v472_v15  ;;  %v486_v52 = vld [vmem:[#allocation5 + $0x230] sm:$0xff]  ;;  %v467_v13 = vld [vmem:[#allocation5 + $0x198] sm:$0xff]  ;;  %v433_v14 = vld [vmem:[#allocation5 + $0x88] sm:$0xff] }
  0x5b   :  { %593 = vmatpush.msra.mxu2 %v504_v16  ;;  %613 = vmatpush.msra.mxu3 %v536_v17  ;;  %v518_v53 = vld [vmem:[#allocation5 + $0x330] sm:$0xff]  ;;  %v516_v15 = vld [vmem:[#allocation5 + $0x320] sm:$0xff]  ;;  %v431_v16 = vld [vmem:[#allocation5 + $0x78] sm:$0xff] }
  0x5c   :  { %554 = vmatpush.msra.mxu0 %v438_v18  ;;  %574 = vmatpush.msra.mxu1 %v470_v19  ;;  %v418_v57 = vld [vmem:[#allocation5 + $0x10] sm:$0xff]  ;;  %v465_v17 = vld [vmem:[#allocation5 + $0x188] sm:$0xff] }
  0x5d   :  { %594 = vmatpush.msra.mxu2 %v502_v20  ;;  %614 = vmatpush.msra.mxu3 %v534_v21  ;;  %v450_v58 = vld [vmem:[#allocation5 + $0x110] sm:$0xff]  ;;  %v509_v18 = vld [vmem:[#allocation5 + $0x2e8] sm:$0xff]  ;;  %v463_v21 = vld [vmem:[#allocation5 + $0x178] sm:$0xff] }
  0x5e   :  { %555 = vmatpush.msra.mxu0 %v436_v22  ;;  %575 = vmatpush.msra.mxu1 %v468_v23  ;;  %v482_v59 = vld [vmem:[#allocation5 + $0x210] sm:$0xff]  ;;  %v429_v20 = vld [vmem:[#allocation5 + $0x68] sm:$0xff]  ;;  %v507_v22 = vld [vmem:[#allocation5 + $0x2d8] sm:$0xff] }
  0x5f   :  { %595 = vmatpush.msra.mxu2 %v500_v24  ;;  %615 = vmatpush.msra.mxu3 %v532_v25  ;;  %v514_v19 = vld [vmem:[#allocation5 + $0x310] sm:$0xff]  ;;  %v512_v23 = vld [vmem:[#allocation5 + $0x300] sm:$0xff]  ;;  %v427_v24 = vld [vmem:[#allocation5 + $0x58] sm:$0xff] }
  0x60   :  { %556 = vmatpush.msra.mxu0 %v434_v26  ;;  %576 = vmatpush.msra.mxu1 %v466_v27  ;;  %v461_v25 = vld [vmem:[#allocation5 + $0x168] sm:$0xff]  ;;  %v543_v27 = vld [vmem:[#allocation5 + $0x3f8] sm:$0xff] }
  0x61   :  { %596 = vmatpush.msra.mxu2 %v498_v28  ;;  %616 = vmatpush.msra.mxu3 %v530_v29  ;;  %v505_v26 = vld [vmem:[#allocation5 + $0x2c8] sm:$0xff]  ;;  %v459_v29 = vld [vmem:[#allocation5 + $0x158] sm:$0xff] }
  0x62   :  { %557 = vmatpush.msra.mxu0 %v432_v30  ;;  %577 = vmatpush.msra.mxu1 %v464_v31  ;;  %v425_v28 = vld [vmem:[#allocation5 + $0x48] sm:$0xff]  ;;  %v503_v30 = vld [vmem:[#allocation5 + $0x2b8] sm:$0xff] }
  0x63   :  { %597 = vmatpush.msra.mxu2 %v496_v32  ;;  %617 = vmatpush.msra.mxu3 %v528_v33  ;;  %v541_v31 = vld [vmem:[#allocation5 + $0x3e8] sm:$0xff]  ;;  %v423_v32 = vld [vmem:[#allocation5 + $0x38] sm:$0xff] }
  0x64   :  { %558 = vmatpush.msra.mxu0 %v430_v34  ;;  %578 = vmatpush.msra.mxu1 %v462_v35  ;;  %v457_v33 = vld [vmem:[#allocation5 + $0x148] sm:$0xff]  ;;  %v539_v35 = vld [vmem:[#allocation5 + $0x3d8] sm:$0xff] }
  0x65   :  { %598 = vmatpush.msra.mxu2 %v494_v36  ;;  %618 = vmatpush.msra.mxu3 %v526_v37  ;;  %v501_v34 = vld [vmem:[#allocation5 + $0x2a8] sm:$0xff]  ;;  %v455_v37 = vld [vmem:[#allocation5 + $0x138] sm:$0xff] }
  0x66   :  { %559 = vmatpush.msra.mxu0 %v428_v38  ;;  %579 = vmatpush.msra.mxu1 %v460_v39  ;;  %v421_v36 = vld [vmem:[#allocation5 + $0x28] sm:$0xff]  ;;  %v499_v38 = vld [vmem:[#allocation5 + $0x298] sm:$0xff] }
  0x67   :  { %599 = vmatpush.msra.mxu2 %v492_v40  ;;  %619 = vmatpush.msra.mxu3 %v524_v41  ;;  %v537_v39 = vld [vmem:[#allocation5 + $0x3c8] sm:$0xff]  ;;  %v419_v40 = vld [vmem:[#allocation5 + $0x18] sm:$0xff] }
  0x68   :  { %560 = vmatpush.msra.mxu0 %v426_v42  ;;  %580 = vmatpush.msra.mxu1 %v458_v43  ;;  %v453_v41 = vld [vmem:[#allocation5 + $0x128] sm:$0xff]  ;;  %v535_v43 = vld [vmem:[#allocation5 + $0x3b8] sm:$0xff] }
  0x69   :  { %600 = vmatpush.msra.mxu2 %v490_v44  ;;  %620 = vmatpush.msra.mxu3 %v522_v45  ;;  %v497_v42 = vld [vmem:[#allocation5 + $0x288] sm:$0xff]  ;;  %v451_v45 = vld [vmem:[#allocation5 + $0x118] sm:$0xff] }
  0x6a   :  { %561 = vmatpush.msra.mxu0 %v424_v46  ;;  %581 = vmatpush.msra.mxu1 %v456_v47  ;;  %v417_v44 = vld [vmem:[#allocation5 + $0x8] sm:$0xff]  ;;  %v495_v46 = vld [vmem:[#allocation5 + $0x278] sm:$0xff] }
  0x6b   :  { %601 = vmatpush.msra.mxu2 %v488_v48  ;;  %621 = vmatpush.msra.mxu3 %v520_v49  ;;  %v533_v47 = vld [vmem:[#allocation5 + $0x3a8] sm:$0xff] }
  0x6c   :  { %562 = vmatpush.msra.mxu0 %v422_v50  ;;  %582 = vmatpush.msra.mxu1 %v454_v51  ;;  %v449_v48 = vld [vmem:[#allocation5 + $0x108] sm:$0xff]  ;;  %v531_v50 = vld [vmem:[#allocation5 + $0x398] sm:$0xff] }
  0x6d   :  { %602 = vmatpush.msra.mxu2 %v486_v52  ;;  %622 = vmatpush.msra.mxu3 %v518_v53  ;;  %v493_v49 = vld [vmem:[#allocation5 + $0x268] sm:$0xff]  ;;  %v491_v51 = vld [vmem:[#allocation5 + $0x258] sm:$0xff] }
  0x6e   :  { %563 = vmatpush.msra.mxu0 %v420_v54  ;;  %583 = vmatpush.msra.mxu1 %v452_v55  ;;  %v529_v52 = vld [vmem:[#allocation5 + $0x388] sm:$0xff]  ;;  %v527_v54 = vld [vmem:[#allocation5 + $0x378] sm:$0xff] }
  0x6f   :  { %603 = vmatpush.msra.mxu2 %v484_v56  ;;  %623 = vmatpush.msra.mxu3 %v516_v15  ;;  %v489_v53 = vld [vmem:[#allocation5 + $0x248] sm:$0xff]  ;;  %v487_v55 = vld [vmem:[#allocation5 + $0x238] sm:$0xff] }
  0x70   :  { %564 = vmatpush.msra.mxu0 %v418_v57  ;;  %584 = vmatpush.msra.mxu1 %v450_v58  ;;  %v525_v56 = vld [vmem:[#allocation5 + $0x368] sm:$0xff]  ;;  %v523_v58 = vld [vmem:[#allocation5 + $0x358] sm:$0xff] }
  0x71   :  { %604 = vmatpush.msra.mxu2 %v482_v59  ;;  %624 = vmatpush.msra.mxu3 %v514_v19  ;;  %v485_v57 = vld [vmem:[#allocation5 + $0x228] sm:$0xff]  ;;  %v483_v59 = vld [vmem:[#allocation5 + $0x218] sm:$0xff] }
  0x72   :  { %565 = vmatpush.msra.mxu0 %v416_v60  ;;  %585 = vmatpush.msra.mxu1 %v448_v61  ;;  %v521_v60 = vld [vmem:[#allocation5 + $0x348] sm:$0xff]  ;;  %v390_v61 = vld [vmem:[%s975_s2] sm:$0xf] }
  0x73   :  { %605 = vmatpush.msra.mxu2 %v480_v0  ;;  %625 = vmatpush.msra.mxu3 %v512_v23  ;;  %v392_v0 = vperm.slane %v390_v61, 0  ;;  %v395_v23 = vperm.slane %v390_v61, 3 }
  0x74   :  { %630 = vmatpush.msrb.mxu0 %v447_v62  ;;  %650 = vmatpush.msrb.mxu1 %v479_v63  ;;  %v481_v62 = vld [vmem:[#allocation5 + $0x208] sm:$0xff]  ;;  %v519_v63 = vld [vmem:[#allocation5 + $0x338] sm:$0xff] }
  0x75   :  { %670 = vmatpush.msrb.mxu2 %v511_v3  ;;  %690 = vmatpush.msrb.mxu3 %v543_v27 }
  0x76   :  { %631 = vmatpush.msrb.mxu0 %v445_v1  ;;  %651 = vmatpush.msrb.mxu1 %v477_v2  ;;  %v517_v1 = vld [vmem:[#allocation5 + $0x328] sm:$0xff] }
  0x77   :  { %671 = vmatpush.msrb.mxu2 %v509_v18  ;;  %691 = vmatpush.msrb.mxu3 %v541_v31  ;;  %v731_v31 = vld [vmem:[#allocation7 + $0x78] sm:$0xff] }
  0x78   :  { %632 = vmatpush.msrb.mxu0 %v443_v4  ;;  %652 = vmatpush.msrb.mxu1 %v475_v5  ;;  %v393_v4 = vperm.slane %v390_v61, 1 }
  0x79   :  { %672 = vmatpush.msrb.mxu2 %v507_v22  ;;  %692 = vmatpush.msrb.mxu3 %v539_v35  ;;  %v727_v35 = vld [vmem:[#allocation7 + $0x58] sm:$0xff] }
  0x7a   :  { %633 = vmatpush.msrb.mxu0 %v441_v6  ;;  %653 = vmatpush.msrb.mxu1 %v473_v7 }
  0x7b   :  { %673 = vmatpush.msrb.mxu2 %v505_v26  ;;  %693 = vmatpush.msrb.mxu3 %v537_v39  ;;  %v725_v39 = vld [vmem:[#allocation7 + $0x48] sm:$0xff] }
  0x7c   :  { %634 = vmatpush.msrb.mxu0 %v439_v8  ;;  %654 = vmatpush.msrb.mxu1 %v471_v9  ;;  %v515_v8 = vld [vmem:[#allocation5 + $0x318] sm:$0xff] }
  0x7d   :  { %674 = vmatpush.msrb.mxu2 %v503_v30  ;;  %694 = vmatpush.msrb.mxu3 %v535_v43  ;;  %v723_v43 = vld [vmem:[#allocation7 + $0x38] sm:$0xff] }
  0x7e   :  { %635 = vmatpush.msrb.mxu0 %v437_v10  ;;  %655 = vmatpush.msrb.mxu1 %v469_v11  ;;  %v513_v11 = vld [vmem:[#allocation5 + $0x308] sm:$0xff] }
  0x7f   :  { %675 = vmatpush.msrb.mxu2 %v501_v34  ;;  %695 = vmatpush.msrb.mxu3 %v533_v47  ;;  %v728_v34 = vld [vmem:[#allocation7 + $0x60] sm:$0xff]  ;;  %v721_v47 = vld [vmem:[#allocation7 + $0x28] sm:$0xff] }
  0x80   :  { %636 = vmatpush.msrb.mxu0 %v435_v12  ;;  %656 = vmatpush.msrb.mxu1 %v467_v13 }
  0x81   :  { %676 = vmatpush.msrb.mxu2 %v499_v38  ;;  %696 = vmatpush.msrb.mxu3 %v531_v50  ;;  %v746_v38 = vld [vmem:[#allocation7 + $0xf0] sm:$0xff]  ;;  %v740_v50 = vld [vmem:[#allocation7 + $0xc0] sm:$0xff] }
  0x82   :  { %637 = vmatpush.msrb.mxu0 %v433_v14  ;;  %657 = vmatpush.msrb.mxu1 %v465_v17  ;;  %v394_v17 = vperm.slane %v390_v61, 2  ;;  %v733_v61 = vld [vmem:[#allocation7 + $0x88] sm:$0xff] }
  0x83   :  { %677 = vmatpush.msrb.mxu2 %v497_v42  ;;  %697 = vmatpush.msrb.mxu3 %v529_v52  ;;  %v744_v42 = vld [vmem:[#allocation7 + $0xe0] sm:$0xff]  ;;  %v739_v52 = vld [vmem:[#allocation7 + $0xb8] sm:$0xff] }
  0x84   :  { %638 = vmatpush.msrb.mxu0 %v431_v16  ;;  %658 = vmatpush.msrb.mxu1 %v463_v21 }
  0x85   :  { %678 = vmatpush.msrb.mxu2 %v495_v46  ;;  %698 = vmatpush.msrb.mxu3 %v527_v54  ;;  %v742_v46 = vld [vmem:[#allocation7 + $0xd0] sm:$0xff] }
  0x86   :  { %639 = vmatpush.msrb.mxu0 %v429_v20  ;;  %659 = vmatpush.msrb.mxu1 %v461_v25  ;;  %v738_v54 = vld [vmem:[#allocation7 + $0xb0] sm:$0xff] }
  0x87   :  { %679 = vmatpush.msrb.mxu2 %v493_v49  ;;  %699 = vmatpush.msrb.mxu3 %v525_v56  ;;  %v720_v49 = vld [vmem:[#allocation7 + $0x20] sm:$0xff]  ;;  %v737_v56 = vld [vmem:[#allocation7 + $0xa8] sm:$0xff] }
  0x88   :  { %640 = vmatpush.msrb.mxu0 %v427_v24  ;;  %660 = vmatpush.msrb.mxu1 %v459_v29 }
  0x89   :  { %680 = vmatpush.msrb.mxu2 %v491_v51  ;;  %700 = vmatpush.msrb.mxu3 %v523_v58  ;;  %v719_v51 = vld [vmem:[#allocation7 + $0x18] sm:$0xff]  ;;  %v736_v58 = vld [vmem:[#allocation7 + $0xa0] sm:$0xff] }
  0x8a   :  { %641 = vmatpush.msrb.mxu0 %v425_v28  ;;  %661 = vmatpush.msrb.mxu1 %v457_v33  ;;  %v729_v33 = vld [vmem:[#allocation7 + $0x68] sm:$0xff] }
  0x8b   :  { %681 = vmatpush.msrb.mxu2 %v489_v53  ;;  %701 = vmatpush.msrb.mxu3 %v521_v60  ;;  %v718_v53 = vld [vmem:[#allocation7 + $0x10] sm:$0xff] }
  0x8c   :  { %642 = vmatpush.msrb.mxu0 %v423_v32  ;;  %662 = vmatpush.msrb.mxu1 %v455_v37  ;;  %v730_v32 = vld [vmem:[#allocation7 + $0x70] sm:$0xff] }
  0x8d   :  { %682 = vmatpush.msrb.mxu2 %v487_v55  ;;  %702 = vmatpush.msrb.mxu3 %v519_v63  ;;  %v726_v37 = vld [vmem:[#allocation7 + $0x50] sm:$0xff]  ;;  %v717_v55 = vld [vmem:[#allocation7 + $0x8] sm:$0xff]  ;;  %v544_v63 = vld [vmem:[%s977_s4] sm:$0x3] }
  0x8e   :  { %643 = vmatpush.msrb.mxu0 %v421_v36  ;;  %663 = vmatpush.msrb.mxu1 %v453_v41  ;;  %v747_v36 = vld [vmem:[#allocation7 + $0xf8] sm:$0xff]  ;;  %v724_v41 = vld [vmem:[#allocation7 + $0x40] sm:$0xff]  ;;  %v734_v60 = vld [vmem:[#allocation7 + $0x90] sm:$0xff] }
  0x8f   :  { %683 = vmatpush.msrb.mxu2 %v485_v57  ;;  %703 = vmatpush.msrb.mxu3 %v517_v1  ;;  %v716_v57 = vld [vmem:[#allocation7] sm:$0xff]  ;;  %v546_v1 = vperm.slane %v544_v63, 0 }
  0x90   :  { %644 = vmatpush.msrb.mxu0 %v419_v40  ;;  %664 = vmatpush.msrb.mxu1 %v451_v45  ;;  %v745_v40 = vld [vmem:[#allocation7 + $0xe8] sm:$0xff]  ;;  %v722_v45 = vld [vmem:[#allocation7 + $0x30] sm:$0xff] }
  0x91   :  { %684 = vmatpush.msrb.mxu2 %v483_v59  ;;  %704 = vmatpush.msrb.mxu3 %v515_v8  ;;  %v735_v59 = vld [vmem:[#allocation7 + $0x98] sm:$0xff] }
  0x92   :  { %645 = vmatpush.msrb.mxu0 %v417_v44  ;;  %665 = vmatpush.msrb.mxu1 %v449_v48  ;;  %v743_v44 = vld [vmem:[#allocation7 + $0xd8] sm:$0xff]  ;;  %v741_v48 = vld [vmem:[#allocation7 + $0xc8] sm:$0xff] }
  0x93   :  { %685 = vmatpush.msrb.mxu2 %v481_v62  ;;  %705 = vmatpush.msrb.mxu3 %v513_v11  ;;  %v732_v62 = vld [vmem:[#allocation7 + $0x80] sm:$0xff] }
  0xc0   :  { %v232_v2 = vpop.f32.mrf.mxu0  ;;  %v252_v3 = vpop.f32.mrf.mxu1 }
  0xc1   :  { %v253_v5 = vadd.f32 %v252_v3, %v232_v2  ;;  %v272_v6 = vpop.f32.mrf.mxu2  ;;  %v292_v7 = vpop.f32.mrf.mxu3 }
  0xc2   :  { %v293_v9 = vadd.f32 %v292_v7, %v272_v6  ;;  %v547_v6 = vperm.slane %v544_v63, 1 }
  0xc3   :  { %v400_v10 = vadd.f32 %v392_v0, %v253_v5 }
  0xc4   :  { %v401_v12 = vadd.f32 %v393_v4, %v293_v9 }
  0xc5   :  { %v408_v13 = vmul.f32 0.2, %v400_v10  ;;  %vm404_vm0 = vcmp.gt.f32.partialorder %v400_v10, 0.0 }
  0xc6   :  { %v409_v14 = vmul.f32 0.2, %v401_v12  ;;  %vm405_vm1 = vcmp.gt.f32.partialorder %v401_v12, 0.0 }
  0xc7   :  { %v412_v15 = vsel %vm404_vm0, %v400_v10, %v408_v13 }
  0xc8   :  { %566 = vmatmul.f32.vlgmr.msra.gmra.mxu0 %v412_v15  ;;  %v413_v16 = vsel %vm405_vm1, %v401_v12, %v409_v14 }
  0xc9   :  { %586 = vmatmul.f32.vlgmr.msra.gmra.mxu1 %v413_v16  ;;  %752 = vmatpush.msra.mxu0 %v731_v31 }
  0xca   :  { %772 = vmatpush.msra.mxu1 %v747_v36 }
  0xcb   :  { %753 = vmatpush.msra.mxu0 %v730_v32 }
  0xcc   :  { %773 = vmatpush.msra.mxu1 %v746_v38 }
  0xcd   :  { %754 = vmatpush.msra.mxu0 %v729_v33 }
  0xce   :  { %774 = vmatpush.msra.mxu1 %v745_v40 }
  0xcf   :  { %v312_v18 = vpop.f32.mrf.mxu0  ;;  %v332_v19 = vpop.f32.mrf.mxu1  ;;  %755 = vmatpush.msra.mxu0 %v728_v34 }
  0xd0   :  { %v333_v20 = vadd.f32 %v332_v19, %v312_v18  ;;  %646 = vmatmul.f32.vlgmr.msrb.gmra.mxu0 %v412_v15  ;;  %775 = vmatpush.msra.mxu1 %v744_v42 }
  0xd1   :  { %666 = vmatmul.f32.vlgmr.msrb.gmra.mxu1 %v413_v16  ;;  %756 = vmatpush.msra.mxu0 %v727_v35 }
  0xd2   :  { %v402_v21 = vadd.f32 %v394_v17, %v333_v20  ;;  %776 = vmatpush.msra.mxu1 %v743_v44 }
  0xd3   :  { %757 = vmatpush.msra.mxu0 %v726_v37 }
  0xd4   :  { %v410_v22 = vmul.f32 0.2, %v402_v21  ;;  %vm406_vm2 = vcmp.gt.f32.partialorder %v402_v21, 0.0  ;;  %777 = vmatpush.msra.mxu1 %v742_v46 }
  0xd5   :  { %758 = vmatpush.msra.mxu0 %v725_v39 }
  0xd6   :  { %v352_v24 = vpop.f32.mrf.mxu2  ;;  %v372_v25 = vpop.f32.mrf.mxu3  ;;  %v414_v26 = vsel %vm406_vm2, %v402_v21, %v410_v22  ;;  %778 = vmatpush.msra.mxu1 %v741_v48  ;;  %v808_v22 = vld [vmem:[%s979_s6] ss:$0 sm:$0xff] }
  0xd7   :  { %v373_v27 = vadd.f32 %v372_v25, %v352_v24  ;;  %606 = vmatmul.f32.vlgmr.msra.gmra.mxu2 %v414_v26  ;;  %759 = vmatpush.msra.mxu0 %v724_v41 }
  0xd8   :  { %779 = vmatpush.msra.mxu1 %v740_v50 }
  0xd9   :  { %v403_v28 = vadd.f32 %v395_v23, %v373_v27  ;;  %760 = vmatpush.msra.mxu0 %v723_v43 }
  0xda   :  { %780 = vmatpush.msra.mxu1 %v739_v52 }
  0xdb   :  { %v411_v29 = vmul.f32 0.2, %v403_v28  ;;  %vm407_vm3 = vcmp.gt.f32.partialorder %v403_v28, 0.0  ;;  %761 = vmatpush.msra.mxu0 %v722_v45 }
  0xdc   :  { %781 = vmatpush.msra.mxu1 %v738_v54 }
  0xdd   :  { %v415_v30 = vsel %vm407_vm3, %v403_v28, %v411_v29  ;;  %762 = vmatpush.msra.mxu0 %v721_v47 }
  0xde   :  { %626 = vmatmul.f32.vlgmr.msra.gmra.mxu3 %v415_v30  ;;  %782 = vmatpush.msra.mxu1 %v737_v56 }
  0xdf   :  { %686 = vmatmul.f32.vlgmr.msrb.gmra.mxu2 %v414_v26  ;;  %763 = vmatpush.msra.mxu0 %v720_v49 }
  0xe0   :  { %783 = vmatpush.msra.mxu1 %v736_v58 }
  0xe1   :  { %764 = vmatpush.msra.mxu0 %v719_v51 }
  0xe2   :  { %784 = vmatpush.msra.mxu1 %v735_v59 }
  0xe3   :  { %765 = vmatpush.msra.mxu0 %v718_v53 }
  0xe4   :  { %785 = vmatpush.msra.mxu1 %v734_v60 }
  0xe5   :  { %766 = vmatpush.msra.mxu0 %v717_v55 }
  0xe6   :  { %706 = vmatmul.f32.vlgmr.msrb.gmra.mxu3 %v415_v30  ;;  %786 = vmatpush.msra.mxu1 %v733_v61 }
  0xe7   :  { %767 = vmatpush.msra.mxu0 %v716_v57 }
  0xe8   :  { %787 = vmatpush.msra.mxu1 %v732_v62 }
 0x145   :  { %v567_v0 = vpop.f32.mrf.mxu0 }
 0x146   :  { %v587_v2 = vpop.f32.mrf.mxu1  ;;  %v568_v3 = vadd.f32 %v567_v0, %v546_v1 }
 0x148   :  { %v588_v5 = vadd.f32 %v587_v2, %v568_v3 }
 0x14d   :  { %v647_v7 = vpop.f32.mrf.mxu0 }
 0x14e   :  { %v648_v10 = vadd.f32 %v647_v7, %v547_v6  ;;  %v667_v12 = vpop.f32.mrf.mxu1 }
 0x150   :  { %v668_v15 = vadd.f32 %v667_v12, %v648_v10 }
 0x15a   :  { %v607_v4 = vpop.f32.mrf.mxu2 }
 0x15b   :  { %v608_v8 = vadd.f32 %v607_v4, %v588_v5 }
 0x161   :  { %v627_v9 = vpop.f32.mrf.mxu3 }
 0x162   :  { %v628_v11 = vadd.f32 %v627_v9, %v608_v8  ;;  %v687_v14 = vpop.f32.mrf.mxu2 }
 0x163   :  { %v688_v17 = vadd.f32 %v687_v14, %v668_v15 }
 0x164   :  { %vm710_vm4 = vcmp.gt.f32.partialorder %v628_v11, 0.0  ;;  %v712_v13 = vmul.f32 0.2, %v628_v11 }
 0x166   :  { %v714_v16 = vsel %vm710_vm4, %v628_v11, %v712_v13 }
 0x167   :  { %768 = vmatmul.f32.vlgmr.msra.gmra.mxu0 %v714_v16 }
 0x169   :  { %v707_v18 = vpop.f32.mrf.mxu3 }
 0x16a   :  { %v708_v19 = vadd.f32 %v707_v18, %v688_v17 }
 0x16c   :  { %vm711_vm5 = vcmp.gt.f32.partialorder %v708_v19, 0.0  ;;  %v713_v20 = vmul.f32 0.2, %v708_v19 }
 0x16e   :  { %v715_v21 = vsel %vm711_vm5, %v708_v19, %v713_v20 }
 0x16f   :  { %788 = vmatmul.f32.vlgmr.msra.gmra.mxu1 %v715_v21 }
 0x1e4   :  { %v769_v23 = vpop.f32.mrf.mxu0 }
 0x1e5   :  { %v770_v24 = vadd.f32 %v808_v22, %v769_v23 }
 0x1ec   :  { %v789_v25 = vpop.f32.mrf.mxu1 }
 0x1ed   :  { %v790_v26 = vadd.f32 %v789_v25, %v770_v24 }
 0x1ef   :  { %792 = vst [vmem:[%s980_s7] sm:$0xff] %v790_v26 }
 0x1f0   :  { %797 = vsyncpa [#allocation4], 1 }
 0x1f1   :  { %798 = vsyncpa [#allocation6], 1 }

</bundles_post_ra>
